<compile_context>
chip_gen: v7x
topology: tpu7x:2x2x1
jax: 0.10.0
libtpu: 0.0.40
codegen_flags: <defaults>
</compile_context>

<pallas_src>
import math

import jax
import jax.numpy as jnp
from jax.experimental import pallas as pl
from jax.experimental.pallas import tpu as pltpu


# ----------------------------------------------------------------- helpers ---
def flatten_ids(ids):
    return [c for cluster in ids for c in cluster]


def inv(perm):
    inverse = [0] * len(perm)
    for i, p in enumerate(perm):
        inverse[p] = i
    return inverse


def round_up(x, m):
    return ((x + m - 1) // m) * m


# ------------------------------------------------------------ Pallas kernel --
def net_kernel(x_ref, w1t_ref, b1_ref, w2t_ref, b2_ref, out_ref):
    """Fused out = relu(x @ W1^T + b1) @ W2^T + b2 for one batch tile.

    x / W1^T / W2^T are bf16 (single-pass MXU matmuls, f32 accumulation);
    bias add + relu run on the VPU in f32.
    """
    h = jnp.dot(x_ref[...], w1t_ref[...], preferred_element_type=jnp.float32)
    h = jnp.maximum(h + b1_ref[...], 0.0)
    o = jnp.dot(h.astype(jnp.bfloat16), w2t_ref[...],
                preferred_element_type=jnp.float32)
    out_ref[...] = o + b2_ref[...]


# ------------------------------------------------- structured weight builder --
def build_M(w_diag, w_off, cluster_of, out_features, in_features, num_nodes):
    """Dense (out, in, N, N) tensor M[o, f, n, m] reproducing
    rearrange(M_diag) + (1/N)*rearrange(M_off) of Sn_coarsen_layer
    (covers both the num_cluster < N and num_cluster == N branches)."""
    same = (cluster_of[:, None] == cluster_of[None, :]).astype(jnp.float32)   # (N,N)
    Md = w_diag[:, cluster_of][:, :, None] * same[None, :, :]                 # (OF,N,N)
    Mo = w_off[:, cluster_of, :][:, :, cluster_of]                            # (OF,N,N)
    return (Md + Mo / num_nodes).reshape(out_features, in_features,
                                         num_nodes, num_nodes)


# --------------------------------------------------------------- parameters --
def init_layer_params(key, in_features, out_features, num_cluster):
    """Matches Sn_coarsen_layer.__init__ + reset_weight (uniform(-stdv, stdv))."""
    stdv = 1.0 / math.sqrt(out_features)
    k1, k2, k3 = jax.random.split(key, 3)
    w_diag = jax.random.uniform(k1, (in_features * out_features, num_cluster),
                                minval=-stdv, maxval=stdv, dtype=jnp.float32)
    w_off = jax.random.uniform(k2, (in_features * out_features,
                                    num_cluster, num_cluster),
                               minval=-stdv, maxval=stdv, dtype=jnp.float32)
    b = jax.random.uniform(k3, (out_features,),
                           minval=-stdv, maxval=stdv, dtype=jnp.float32)
    return w_diag, w_off, b


def prepare_params(params, cluster_ids, in_features, hid_dim, out_features):
    """One-time preprocessing (outside the per-call path):
      * build W1^T / W2^T with the node permutation / inverse permutation
        already folded in, so the caller needs no gathers or transposes,
      * zero-pad to lane-dense (multiple-of-128) shapes, cast to bf16,
      * flatten biases to match the padded column layouts.
    """
    permute_ids = flatten_ids(cluster_ids)
    inv_permute = jnp.array(inv(permute_ids), jnp.int32)
    N = len(permute_ids)
    cluster_sizes = [len(c) for c in cluster_ids]
    cluster_of = jnp.array(
        sum([[i] * s for i, s in enumerate(cluster_sizes)], []), dtype=jnp.int32)

    (wd1, wo1, b1), (wd2, wo2, b2) = params

    K1, Nh, No = in_features * N, hid_dim * N, out_features * N
    K1p, Nhp, Nop = round_up(K1, 128), round_up(Nh, 128), round_up(No, 128)

    # Layer 1: rows in node-major ORIGINAL node order (j, f) so x.reshape(bs, N*in)
    # feeds it directly; columns in the internal (o, n) cluster-order layout.
    M1 = build_M(wd1, wo1, cluster_of, hid_dim, in_features, N)       # (hid,in,N,N)
    M1p = M1[:, :, :, inv_permute]                                    # m -> orig node j
    w1t = jnp.transpose(M1p, (3, 1, 0, 2)).reshape(K1, Nh)            # (N*in, hid*N)

    # Layer 2: rows in the internal (f, m) cluster-order layout (matches layer-1
    # output; relu is elementwise so the intermediate un/re-permute cancels);
    # columns in node-major ORIGINAL node order (j, o) so the flat output
    # reshapes straight to (bs, N, out).
    M2 = build_M(wd2, wo2, cluster_of, out_features, hid_dim, N)      # (out,hid,N,N)
    M2p = M2[:, :, inv_permute, :]                                    # n -> orig node j
    w2t = jnp.transpose(M2p, (1, 3, 2, 0)).reshape(Nh, No)            # (hid*N, N*out)

    w1t_p = jnp.zeros((K1p, Nhp), jnp.bfloat16).at[:K1, :Nh].set(
        w1t.astype(jnp.bfloat16))
    w2t_p = jnp.zeros((Nhp, Nop), jnp.bfloat16).at[:Nh, :No].set(
        w2t.astype(jnp.bfloat16))
    b1_row = jnp.zeros((1, Nhp), jnp.float32).at[0, :Nh].set(jnp.repeat(b1, N))  # (o,n)
    b2_row = jnp.zeros((1, Nop), jnp.float32).at[0, :No].set(jnp.tile(b2, N))    # (j,o)

    return dict(
        w1t=w1t_p, b1=b1_row, w2t=w2t_p, b2=b2_row,
        dims=(N, in_features, hid_dim, out_features, K1p, Nhp, Nop),
    )


# ------------------------------------------------------------------ forward --
def sn_coarsen_net_forward(x, prep, *, block_bs=16):
    """block_bs = batch rows (MXU M dim) per grid step; use 128 for big batches."""
    N, in_f, hid, out_f, K1p, Nhp, Nop = prep["dims"]
    bs = x.shape[0]

    # Permutation is folded into W1^T: flatten node-major, no gather/transpose.
    x_flat = x.reshape(bs, N * in_f)

    # pad batch to the M-tile and columns to 128 lanes; bf16 halves x DMA bytes
    # (kernel computes in bf16 anyway, so numerics are unchanged).
    bs_p = round_up(max(bs, block_bs), block_bs)
    x_pad = jnp.zeros((bs_p, K1p), jnp.bfloat16).at[:bs, :N * in_f].set(
        x_flat.astype(jnp.bfloat16))

    grid = (bs_p // block_bs,)
    flops = 2 * bs_p * (K1p * Nhp + Nhp * Nop)
    bytes_accessed = (x_pad.size * 2 + prep["w1t"].size * 2 + prep["w2t"].size * 2
                      + prep["b1"].size * 4 + prep["b2"].size * 4 + bs_p * Nop * 4)

    out_pad = pl.pallas_call(
        net_kernel,
        out_shape=jax.ShapeDtypeStruct((bs_p, Nop), jnp.float32),
        grid=grid,
        in_specs=[
            pl.BlockSpec((block_bs, K1p), lambda i: (i, 0)),   # batch tile of x
            pl.BlockSpec((K1p, Nhp), lambda i: (0, 0)),        # W1^T VMEM-resident
            pl.BlockSpec((1, Nhp), lambda i: (0, 0)),          # b1 resident
            pl.BlockSpec((Nhp, Nop), lambda i: (0, 0)),        # W2^T resident
            pl.BlockSpec((1, Nop), lambda i: (0, 0)),          # b2 resident
        ],
        out_specs=pl.BlockSpec((block_bs, Nop), lambda i: (i, 0)),
        compiler_params=pltpu.CompilerParams(
            dimension_semantics=("parallel",),   # batch tiles split across TCs
            vmem_limit_bytes=32 * 1024 * 1024),
        cost_estimate=pl.CostEstimate(flops=flops, transcendentals=0,
                                      bytes_accessed=bytes_accessed),
    )(x_pad, prep["w1t"], prep["b1"], prep["w2t"], prep["b2"])

    # Inverse permutation is folded into W2^T's columns: plain reshape only.
    return out_pad[:bs, :N * out_f].reshape(bs, N, out_f)


# --------------------------------------------------------- pure-JAX reference -
def _ref_layer(x, w_diag, w_off, b, cluster_ids, in_features, out_features):
    bs, N, _ = x.shape
    permute_ids = jnp.array(flatten_ids(cluster_ids))
    inv_permute = jnp.array(inv(flatten_ids(cluster_ids)))
    cluster_sizes = [len(c) for c in cluster_ids]
    cluster_of = jnp.array(sum([[i] * s for i, s in enumerate(cluster_sizes)], []),
                           dtype=jnp.int32)
    M = build_M(w_diag, w_off, cluster_of, out_features, in_features, N)
    WT = jnp.transpose(M, (1, 3, 0, 2)).reshape(in_features * N, out_features * N)
    xp = x[:, permute_ids, :]
    xf = jnp.transpose(xp, (0, 2, 1)).reshape(bs, -1)
    of = jnp.dot(xf, WT, precision=jax.lax.Precision.HIGHEST)
    out = of.reshape(bs, out_features, N).transpose(0, 2, 1)
    out = out[:, inv_permute, :]
    return out + b.reshape(1, 1, -1)


def _ref_net(x, params, cluster_ids, in_features, hid_dim, out_features):
    (wd1, wo1, b1), (wd2, wo2, b2) = params
    h = _ref_layer(x, wd1, wo1, b1, cluster_ids, in_features, hid_dim)
    h = jnp.maximum(h, 0.0)
    return _ref_layer(h, wd2, wo2, b2, cluster_ids, hid_dim, out_features)


# --------------------------------------------------------------------- main --
if __name__ == "__main__":
    # 16 nodes, 4 clusters of size 4 (non-trivial node permutation),
    # in_features=4, hid_dim=32, out_features=4, batch=32 (two 16-row M-tiles
    # so the "parallel" batch grid axis is real and pipelined).
    cluster_ids = [[0, 4, 8, 12], [1, 5, 9, 13], [2, 6, 10, 14], [3, 7, 11, 15]]
    num_nodes = 16
    in_features, hid_dim, out_features = 4, 32, 4
    bs = 32
    num_cluster = len(cluster_ids)

    key = jax.random.PRNGKey(0)
    kx, k1, k2 = jax.random.split(key, 3)
    x = jax.random.normal(kx, (bs, num_nodes, in_features), dtype=jnp.float32)

    params = (
        init_layer_params(k1, in_features, hid_dim, num_cluster),
        init_layer_params(k2, hid_dim, out_features, num_cluster),
    )

    prep = prepare_params(params, cluster_ids, in_features, hid_dim, out_features)
    out = sn_coarsen_net_forward(x, prep, block_bs=16)
    out = jax.block_until_ready(out)

    ref = _ref_net(x, params, cluster_ids, in_features, hid_dim, out_features)
    assert out.shape == (bs, num_nodes, out_features)
    # bf16 MXU operands (f32 accumulation) vs f32/HIGHEST reference
    assert jnp.allclose(out, ref, rtol=5e-2, atol=5e-2), "mismatch vs reference"

    print("KERNEL_OK")
</pallas_src>

<mosaic_0001>
module attributes {stable_mosaic.version = 11 : i64} {
  func.func @net_kernel(%arg0: i32, %arg1: memref<16x128xbf16, #tpu.memory_space<vmem>>, %arg2: memref<128x512xbf16, #tpu.memory_space<vmem>>, %arg3: memref<1x512xf32, #tpu.memory_space<vmem>>, %arg4: memref<512x128xbf16, #tpu.memory_space<vmem>>, %arg5: memref<1x128xf32, #tpu.memory_space<vmem>>, %arg6: memref<16x128xf32, #tpu.memory_space<vmem>>) attributes {dimension_semantics = [#tpu.dimension_semantics<parallel>], iteration_bounds = array<i64: 2>, scalar_prefetch = 0 : i64, scratch_operands = 0 : i64, tpu.core_type = #tpu.core_type<tc>, window_params = [{transform_indices = @transform_0, window_bounds = array<i64: 16, 128>}, {pipeline_mode = #tpu.pipeline_mode<synchronous>, transform_indices = @transform_1, window_bounds = array<i64: 128, 512>}, {pipeline_mode = #tpu.pipeline_mode<synchronous>, transform_indices = @transform_2, window_bounds = array<i64: 1, 512>}, {pipeline_mode = #tpu.pipeline_mode<synchronous>, transform_indices = @transform_3, window_bounds = array<i64: 512, 128>}, {pipeline_mode = #tpu.pipeline_mode<synchronous>, transform_indices = @transform_4, window_bounds = array<i64: 1, 128>}, {transform_indices = @transform_5, window_bounds = array<i64: 16, 128>}]} {
    %c0 = arith.constant 0 : index
    %c0_0 = arith.constant 0 : index
    %0 = vector.load %arg1[%c0, %c0_0] : memref<16x128xbf16, #tpu.memory_space<vmem>>, vector<16x128xbf16>
    %c0_1 = arith.constant 0 : index
    %c0_2 = arith.constant 0 : index
    %1 = vector.load %arg2[%c0_1, %c0_2] : memref<128x512xbf16, #tpu.memory_space<vmem>>, vector<128x512xbf16>
    %cst = arith.constant dense<0.000000e+00> : vector<16x512xf32>
    %2 = tpu.matmul %0, %1, %cst {dimension_numbers = #tpu.dot_dimension_numbers<[1], [0], [0], [1], [0, 0, 1, 1], [], []>} : vector<16x128xbf16>, vector<128x512xbf16>, vector<16x512xf32> -> vector<16x512xf32>
    %c0_3 = arith.constant 0 : index
    %c0_4 = arith.constant 0 : index
    %3 = vector.load %arg3[%c0_3, %c0_4] : memref<1x512xf32, #tpu.memory_space<vmem>>, vector<1x512xf32>
    %4 = vector.broadcast %3 : vector<1x512xf32> to vector<16x512xf32>
    %5 = arith.addf %2, %4 : vector<16x512xf32>
    %cst_5 = arith.constant 0.000000e+00 : f32
    %6 = vector.broadcast %cst_5 : f32 to vector<16x512xf32>
    %7 = arith.maximumf %5, %6 : vector<16x512xf32>
    %8 = arith.truncf %7 : vector<16x512xf32> to vector<16x512xbf16>
    %c0_6 = arith.constant 0 : index
    %c0_7 = arith.constant 0 : index
    %9 = vector.load %arg4[%c0_6, %c0_7] : memref<512x128xbf16, #tpu.memory_space<vmem>>, vector<512x128xbf16>
    %cst_8 = arith.constant dense<0.000000e+00> : vector<16x128xf32>
    %10 = tpu.matmul %8, %9, %cst_8 {dimension_numbers = #tpu.dot_dimension_numbers<[1], [0], [0], [1], [0, 0, 1, 1], [], []>} : vector<16x512xbf16>, vector<512x128xbf16>, vector<16x128xf32> -> vector<16x128xf32>
    %c0_9 = arith.constant 0 : index
    %c0_10 = arith.constant 0 : index
    %11 = vector.load %arg5[%c0_9, %c0_10] : memref<1x128xf32, #tpu.memory_space<vmem>>, vector<1x128xf32>
    %12 = vector.broadcast %11 : vector<1x128xf32> to vector<16x128xf32>
    %13 = arith.addf %10, %12 : vector<16x128xf32>
    %c0_11 = arith.constant 0 : index
    %c0_12 = arith.constant 0 : index
    %14 = vector.load %arg6[%c0_11, %c0_12] : memref<16x128xf32, #tpu.memory_space<vmem>>, vector<16x128xf32>
    tpu.vector_store %arg6[%c0_11, %c0_12], %13 {strides = array<i32>} : memref<16x128xf32, #tpu.memory_space<vmem>>, vector<16x128xf32>,
    return
  }
  func.func @transform_0(%arg0: i32) -> (i32, i32) {
    %c0_i32 = arith.constant 0 : i32
    %c0_i32_0 = arith.constant 0 : i32
    return %arg0, %c0_i32 : i32, i32
  }
  func.func @transform_1(%arg0: i32) -> (i32, i32) {
    %c0_i32 = arith.constant 0 : i32
    %c0_i32_0 = arith.constant 0 : i32
    %c0_i32_1 = arith.constant 0 : i32
    return %c0_i32, %c0_i32_0 : i32, i32
  }
  func.func @transform_2(%arg0: i32) -> (i32, i32) {
    %c0_i32 = arith.constant 0 : i32
    %c0_i32_0 = arith.constant 0 : i32
    %c0_i32_1 = arith.constant 0 : i32
    return %c0_i32, %c0_i32_0 : i32, i32
  }
  func.func @transform_3(%arg0: i32) -> (i32, i32) {
    %c0_i32 = arith.constant 0 : i32
    %c0_i32_0 = arith.constant 0 : i32
    %c0_i32_1 = arith.constant 0 : i32
    return %c0_i32, %c0_i32_0 : i32, i32
  }
  func.func @transform_4(%arg0: i32) -> (i32, i32) {
    %c0_i32 = arith.constant 0 : i32
    %c0_i32_0 = arith.constant 0 : i32
    %c0_i32_1 = arith.constant 0 : i32
    return %c0_i32, %c0_i32_0 : i32, i32
  }
  func.func @transform_5(%arg0: i32) -> (i32, i32) {
    %c0_i32 = arith.constant 0 : i32
    %c0_i32_0 = arith.constant 0 : i32
    return %arg0, %c0_i32 : i32, i32
  }
}

</mosaic_0001>

<bundles_post_ra>
// kernel: tpu_custom_call.1
= control target key start
LH: loop header
LB: loop body
LE: loop exit
PB: predicated region body
PF: predicated region fallthrough
CT: control target
= control target key end

     0   :  { %10 = vsyncpa [#allocation3], 0  ;;  %s1782_s0 = inlined_call_operand.hbm [shape: bf16[32,128], index: 0, kind: input, shape index: {}]   ;;  %s1783_s1 = inlined_call_operand.hbm [shape: bf16[128,512], index: 1, kind: input, shape index: {}]   ;;  %s1784_s2 = inlined_call_operand.vmem [shape: f32[1,512], index: 2, kind: input, shape index: {}]   ;;  %s1785_s3 = inlined_call_operand.hbm [shape: bf16[512,128], index: 3, kind: input, shape index: {}]   ;;  %s1786_s4 = inlined_call_operand.vmem [shape: f32[1,128], index: 4, kind: input, shape index: {}]   ;;  %s1787_s5 = inlined_call_operand.hbm [shape: f32[32,128], index: 5, kind: output, shape index: {}]  }
   0x1   :  { %12 = vsyncpa [#allocation3 + $0x1], 0 }
   0x2   :  { %13 = vsyncpa [#allocation6], 0 }
   0x3   :  { %14 = vsyncpa [#allocation4], 0 }
   0x4   :  { %16 = vsyncpa [#allocation4 + $0x1], 0  ;;  %s1532_s18 = smov 0   ;;  %s1534_s19 = smov 0  }
   0x5   :  { %s1536_s20 = smov 0   ;;  %s1538_s21 = smov 0  }
   0x6 LB: > { %s1553_s22 = sadd.s32 4294967295, %s1489_s21   ;;  %s1048_s23 = sadd.s32 4294967294, %s1489_s21   ;;  %s1489_s21 = sphi %s1538_s21, %s1807_s21   ;;  %s1485_s20 = sphi %s1536_s20, %s1806_s20   ;;  %s1481_s19 = sphi %s1534_s19, %s1805_s19   ;;  %s1477_s18 = sphi %s1532_s18, %s1804_s18  }
   0x7   : > { %p42_p0 = scmp.ne.s32.totalorder %s1481_s19, %s1477_s18  ;;  %p1788_p1 = scmp.eq.s32.totalorder %s1553_s22, 0 }
   0x8   : > { %p156_p3 = scmp.eq.s32.totalorder %s1048_s23, 1  ;;  %p1049_p5 = scmp.ge.s32.totalorder %s1489_s21, 1 }
   0x9   : > { %p1562_p4 = por %p1788_p1, %p42_p0  ;;  %p163_p7 = scmp.lt.s32.totalorder %s1489_s21, 3 }
   0xa   : > { %p1567_p6 = por %p156_p3, %p42_p0  ;;  %s1491_s27 = smov [#allocation5]  }
   0xb   : > { %s1791_s24 = scalar_select %p1562_p4, 1, 0 }
   0xc   : > { %s1792_s25 = scalar_select %p1567_p6, 1, 0 }
   0xd   : > { %p1572_p8 = pnand %p1049_p5, %p163_p7  ;;  %s175_s28 = sshll.u32 %s1491_s27, 4  ;;  %s1576_s28 = int_to_ptr.vmem [resolvable:$true] %s175_s28 }
   0xe   : > { %s1492_s30 = smov [#allocation7]   ;;  %s1333_s9 = scalar_lea.hbm %s1783_s1, 4096 }
   0xf   : > { %p1190_p9 = pneg %p1572_p8  ;;  %s191_s6 = sshll.u32 %s1492_s30, 4  ;;  %s1587_s6 = int_to_ptr.vmem [resolvable:$true] %s191_s6 }
  0x10   : > { %p1334_p12 = scmp.ne.s32.totalorder %s1783_s1, %s1333_s9  ;;  %p1340_p5 = scmp.lt.u32.totalorder %s1333_s9, %s1783_s1 }
  0x11   : > { %p1583_p11 = pnand %p1190_p9, %p1788_p1 }
  0x13   : > { %p1335_p13 = pneg %p1583_p11 }
  0x15   : > { %p1336_p0 = pnand %p1335_p13, %p1334_p12 }
  0x17   : > { %p1337_p3 = pneg %p1336_p0 }
  0x19   : > { %p1342_p7 = pnand %p1340_p5, %p1337_p3 }
  0x1b   : > { %1345 = shalt.err (!%p1342_p7)
}
  0x1c   : > { %s1346_s14 = scalar_lea.vmem %s1576_s28, 4096  ;;  %p1354_p2 = scmp.lt.s32.totalorder %s1576_s28, %s1576_s28 }
  0x1d   : > { %p1347_p9 = scmp.ne.s32.totalorder %s1576_s28, %s1346_s14  ;;  %p1355_p12 = scmp.lt.s32.totalorder %s1346_s14, %s1346_s14 }
  0x1f   : > { %p1349_p10 = pnand %p1347_p9, %p1335_p13  ;;  %p1356_p0 = por %p1355_p12, %p1354_p2 }
  0x21   : > { %p1350_p1 = pneg %p1349_p10 }
  0x23   : > { %p1357_p6 = pnand %p1356_p0, %p1350_p1 }
  0x25   : > { %1360 = shalt.err (!%p1357_p6)
}
  0x26   : > { %s1493_s15 = smov 256   ;;  %s1494_s16 = smov 16  }
  0x27   : > { %1193 = dma.hbm_to_vmem [thread:$0]  (!%p1583_p11), %s1783_s1, 4096, %s1576_s28, [#allocation6], %s1493_s15, %s1493_s15, %s1494_s16  }
  0x28   : > { %s1361_s7 = scalar_lea.hbm %s1785_s3, 4096 }
  0x29   : > { %p1362_p2 = scmp.ne.s32.totalorder %s1785_s3, %s1361_s7  ;;  %p1368_p10 = scmp.lt.u32.totalorder %s1361_s7, %s1785_s3 }
  0x2b   : > { %p1364_p1 = pnand %p1362_p2, %p1335_p13 }
  0x2d   : > { %p1365_p6 = pneg %p1364_p1 }
  0x2f   : > { %p1370_p3 = pnand %p1368_p10, %p1365_p6 }
  0x31   : > { %1373 = shalt.err (!%p1370_p3)
}
  0x32   : > { %s1374_s28 = scalar_lea.vmem %s1587_s6, 4096  ;;  %p1382_p12 = scmp.lt.s32.totalorder %s1587_s6, %s1587_s6 }
  0x33   : > { %p1375_p5 = scmp.ne.s32.totalorder %s1587_s6, %s1374_s28  ;;  %p1383_p0 = scmp.lt.s32.totalorder %s1374_s28, %s1374_s28 }
  0x35   : > { %p1377_p7 = pnand %p1375_p5, %p1335_p13  ;;  %p1384_p2 = por %p1383_p0, %p1382_p12 }
  0x37   : > { %p1378_p9 = pneg %p1377_p7 }
  0x39   : > { %p1385_p1 = pnand %p1384_p2, %p1378_p9 }
  0x3b   : > { %1388 = shalt.err (!%p1385_p1)
}
  0x3c   : > { %s1495_s12 = smov 64   ;;  %s1496_s13 = smov 4  }
  0x3d   : > { %1196 = dma.hbm_to_vmem [thread:$0]  (!%p1583_p11), %s1785_s3, 4096, %s1587_s6, [#allocation6], %s1495_s12, %s1495_s12, %s1496_s13  }
  0x3e   : > { %s1645_s16 = sadd.s32 1, %s1489_s21   ;;  %s29_s23 = sadd.s32 1, %s1485_s20 }
  0x3f   : > { %s26_s17 = ssub.s32 %s1489_s21, %s1645_s16  ;;  %p36_p6 = scmp.ne.s32.totalorder %s1485_s20, %s1481_s19 }
  0x40   : > { %p27_p13 = scmp.eq.s32.totalorder %s26_s17, 0  ;;  %p37_p10 = scmp.eq.s32.totalorder %s1489_s21, 0 }
  0x41   : > { %p1795_p5 = scmp.eq.s32.totalorder %s1553_s22, 1  ;;  %p1207_p9 = scmp.lt.s32.totalorder %s1489_s21, 2 }
  0x42   : > { %s1654_s27 = scalar_select %p27_p13, %s1485_s20, %s29_s23  }
  0x43   : > { %p38_p3 = por %p37_p10, %p36_p6  ;;  %p1658_p7 = por %p1795_p5, %p36_p6 }
  0x44   : > { %s208_s30 = sand.u32 1, %s1485_s20   ;;  %s1132_s6 = sshll.u32 %s1489_s21, 7 }
  0x45   : > { %s1796_s29 = scalar_select %p1658_p7, 1, 0 }
  0x46   : > { %s1053_s7 = sshll.u32 %s208_s30, 3  ;;  %s1668_s10 = scalar_lea.hbm %s1782_s0, %s1132_s6 }
  0x47   : > { %s212_s11 = scalar_lea.vmem [#allocation2], %s1053_s7  ;;  %p1672_p11 = pnand %p1207_p9, %p38_p3 }
  0x48   : > { %s219_s28 = sshll.u32 %s212_s11, 4  ;;  %s1676_s15 = scalar_lea.sflag [#allocation3], %s208_s30  ;;  %s1670_s28 = int_to_ptr.vmem [resolvable:$true] %s219_s28 }
  0x49   : > { %s1389_s17 = scalar_lea.hbm %s1668_s10, 128  ;;  %p1391_p0 = pneg %p1672_p11 }
  0x4a   : > { %p1390_p12 = scmp.ne.s32.totalorder %s1668_s10, %s1389_s17  ;;  %s1394_s6 = scalar_lea.hbm %s1782_s0, 256 }
  0x4b   : > { %p1395_p13 = scmp.lt.u32.totalorder %s1668_s10, %s1782_s0  ;;  %p1396_p6 = scmp.lt.u32.totalorder %s1394_s6, %s1389_s17 }
  0x4c   : > { %p1392_p2 = pnand %p1391_p0, %p1390_p12  ;;  %p1398_p3 = scmp.lt.u32.totalorder %s1389_s17, %s1668_s10 }
  0x4d   : > { %p1397_p10 = por %p1396_p6, %p1395_p13 }
  0x4e   : > { %p1393_p1 = pneg %p1392_p2 }
  0x4f   : > { %p1399_p5 = por %p1398_p3, %p1397_p10 }
  0x51   : > { %p1400_p9 = pnand %p1399_p5, %p1393_p1 }
  0x53   : > { %1403 = shalt.err (!%p1400_p9)
}
  0x54   : > { %s1404_s30 = scalar_lea.vmem %s1670_s28, 128  ;;  %s1497_s11 = smov [#allocation2]  }
  0x55   : > { %p1405_p12 = scmp.ne.s32.totalorder %s1670_s28, %s1404_s30  ;;  %s1409_s23 = sshll.u32 %s1497_s11, 4  ;;  %s1410_s23 = int_to_ptr.vmem [resolvable:$false] %s1409_s23 }
  0x56   : > { %s1411_s7 = scalar_lea.vmem %s1410_s23, 256  ;;  %p1412_p4 = scmp.lt.s32.totalorder %s1670_s28, %s1410_s23 }
  0x57   : > { %p1407_p2 = pnand %p1405_p12, %p1391_p0  ;;  %p1413_p13 = scmp.lt.s32.totalorder %s1411_s7, %s1404_s30 }
  0x59   : > { %p1408_p7 = pneg %p1407_p2  ;;  %p1414_p6 = por %p1413_p13, %p1412_p4 }
  0x5b   : > { %p1415_p10 = pnand %p1414_p6, %p1408_p7 }
  0x5d   : > { %1418 = shalt.err (!%p1415_p10)
}
  0x5e   : > { %1200 = dma.hbm_to_vmem [thread:$0]  (!%p1672_p11), %s1668_s10, 128, %s1670_s28, %s1676_s15, %s1495_s12, %s1495_s12, %s1496_s13  }
  0x5f   : > { %231 = sbr.rel (%p1572_p8) target bundleno = 598 (0x256), region = 40  ;;  %s1710_s17 = sand.u32 (!%p1572_p8), 1, %s1481_s19  }
  0x60   : > { %s1057_s6 = sshll.u32 (!%p1572_p8), %s1710_s17, 3  ;;  %s234_s8 = scalar_lea.sflag (!%p1572_p8), [#allocation3], %s1710_s17 }
  0x61   : > { %s1714_s9 = scalar_lea.vmem (!%p1572_p8), [#allocation2], %s1057_s6  ;;  %p1798_p4 = scmp.ne.s32.totalorder (!%p1572_p8), %s1791_s24, 0 }
  0x66   : > { %1464 = dma.done.wait (%p1798_p4), %s234_s8, 128  }
  0x67   : > { %1466 = vsyncadd (%p1798_p4), %s234_s8, 4294967168  ;;  %p1799_p7 = scmp.eq.s32.totalorder %s1553_s22, 0 }
  0x69   : > { %1468 = dma.done.wait (%p1799_p7), [#allocation6], 8192   ;;  %p1800_p8 = pmov %p1799_p7 }
  0x6a   : > { %v1498_v0 = vmov 0   ;;  %v1252_v1 = vld [vmem:[#allocation5 + $0x4] ss:$16 sps:$4 sm:$0xff]   ;;  %v1254_v2 = vld [vmem:[#allocation5 + $0xc] ss:$16 sps:$4 sm:$0xff]   ;;  %s1060_s12 = sshll.u32 %s1710_s17, 4 }
  0x6b   : > { %1470 = vsyncadd (%p1800_p8), [#allocation6], 4294959104  ;;  %529 = vmatprep.mubr.bf16.mxu0 %v1498_v0  ;;  %572 = vmatprep.mubr.bf16.mxu1 %v1498_v0  ;;  %v1256_v3 = vld [vmem:[#allocation5] ss:$16 sps:$4 sm:$0xff]   ;;  %v1257_v4 = vld [vmem:[#allocation5 + $0x8] ss:$16 sps:$4 sm:$0xff]  }
  0x6c   : > { %497 = vmatprep.subr.bf16.mxu0 %v1252_v1  ;;  %540 = vmatprep.subr.bf16.mxu1 %v1254_v2  ;;  %v1258_v5 = vld [vmem:[#allocation5 + $0x24] ss:$16 sps:$4 sm:$0xff]   ;;  %v1260_v6 = vld [vmem:[#allocation5 + $0x2c] ss:$16 sps:$4 sm:$0xff]   ;;  %v1262_v7 = vld [vmem:[#allocation5 + $0x20] ss:$16 sps:$4 sm:$0xff]   ;;  %v311_v2 = vlaneseq }
  0x6d   : > { %498 = vmatpush1.bf16.msra.mxu0 %v1256_v3  ;;  %541 = vmatpush1.bf16.msra.mxu1 %v1257_v4  ;;  %v1263_v8 = vld [vmem:[#allocation5 + $0x28] ss:$16 sps:$4 sm:$0xff]   ;;  %v1264_v9 = vld [vmem:[#allocation5 + $0x44] ss:$16 sps:$4 sm:$0xff]   ;;  %v1266_v10 = vld [vmem:[#allocation5 + $0x4c] ss:$16 sps:$4 sm:$0xff]  }
  0x6e   : > { %499 = vmatprep.subr.bf16.mxu0 %v1258_v5  ;;  %542 = vmatprep.subr.bf16.mxu1 %v1260_v6  ;;  %v1268_v11 = vld [vmem:[#allocation5 + $0x40] ss:$16 sps:$4 sm:$0xff]   ;;  %v1269_v12 = vld [vmem:[#allocation5 + $0x48] ss:$16 sps:$4 sm:$0xff]   ;;  %v1270_v13 = vld [vmem:[#allocation5 + $0x64] ss:$16 sps:$4 sm:$0xff]  }
  0x6f   : > { %v1272_v14 = vld [vmem:[#allocation5 + $0x6c] ss:$16 sps:$4 sm:$0xff]   ;;  %v1274_v15 = vld [vmem:[#allocation5 + $0x60] ss:$16 sps:$4 sm:$0xff]   ;;  %v1275_v16 = vld [vmem:[#allocation5 + $0x68] ss:$16 sps:$4 sm:$0xff]  }
  0x70   : > { %v1276_v17 = vld [vmem:[#allocation5 + $0x84] ss:$16 sps:$4 sm:$0xff]   ;;  %v1278_v18 = vld [vmem:[#allocation5 + $0x8c] ss:$16 sps:$4 sm:$0xff]   ;;  %v1280_v19 = vld [vmem:[#allocation5 + $0x80] ss:$16 sps:$4 sm:$0xff]  }
  0x71   : > { %500 = vmatpush1.bf16.msra.mxu0 %v1262_v7  ;;  %543 = vmatpush1.bf16.msra.mxu1 %v1263_v8  ;;  %v1281_v20 = vld [vmem:[#allocation5 + $0x88] ss:$16 sps:$4 sm:$0xff]   ;;  %v1282_v21 = vld [vmem:[#allocation5 + $0xa4] ss:$16 sps:$4 sm:$0xff]   ;;  %v1284_v22 = vld [vmem:[#allocation5 + $0xac] ss:$16 sps:$4 sm:$0xff]  }
  0x72   : > { %501 = vmatprep.subr.bf16.mxu0 %v1264_v9  ;;  %544 = vmatprep.subr.bf16.mxu1 %v1266_v10  ;;  %v1286_v23 = vld [vmem:[#allocation5 + $0xa0] ss:$16 sps:$4 sm:$0xff]   ;;  %v1287_v24 = vld [vmem:[#allocation5 + $0xa8] ss:$16 sps:$4 sm:$0xff]   ;;  %v1288_v25 = vld [vmem:[#allocation5 + $0xc4] ss:$16 sps:$4 sm:$0xff]  }
  0x73   : > { %v1290_v26 = vld [vmem:[#allocation5 + $0xcc] ss:$16 sps:$4 sm:$0xff]   ;;  %v1292_v27 = vld [vmem:[#allocation5 + $0xc0] ss:$16 sps:$4 sm:$0xff]   ;;  %v1293_v28 = vld [vmem:[#allocation5 + $0xc8] ss:$16 sps:$4 sm:$0xff]  }
  0x74   : > { %v1294_v29 = vld [vmem:[#allocation5 + $0xe4] ss:$16 sps:$4 sm:$0xff]   ;;  %v1296_v30 = vld [vmem:[#allocation5 + $0xec] ss:$16 sps:$4 sm:$0xff]   ;;  %v1298_v31 = vld [vmem:[#allocation5 + $0xe0] ss:$16 sps:$4 sm:$0xff]  }
  0x75   : > { %502 = vmatpush1.bf16.msra.mxu0 %v1268_v11  ;;  %545 = vmatpush1.bf16.msra.mxu1 %v1269_v12  ;;  %v1299_v32 = vld [vmem:[#allocation5 + $0xe8] ss:$16 sps:$4 sm:$0xff]   ;;  %v1301_v33 = vld [vmem:[#allocation7 + $0x40] sm:$0xff]   ;;  %v1309_v42 = vld [vmem:[#allocation7 + $0x50] sm:$0xff]   ;;  %v312_v3 = vshrl.u32 %v311_v2, 7  ;;  %s271_s28 = scalar_lea.vmem [#allocation8], %s1060_s12 }
  0x76   : > { %503 = vmatprep.subr.bf16.mxu0 %v1270_v13  ;;  %546 = vmatprep.subr.bf16.mxu1 %v1272_v14  ;;  %v1300_v34 = vld [vmem:[%s1714_s9] sm:$0xff]   ;;  %v1302_v35 = vld [vmem:[#allocation7 + $0xc0] sm:$0xff]   ;;  %v1305_v38 = vld [vmem:[#allocation7 + $0x48] sm:$0xff]   ;;  %s956_s14 = sshll.u32 %s271_s28, 4  ;;  %s1133_s15 = sshll.u32 %s1553_s22, 8  ;;  %s1733_s14 = int_to_ptr.vmem [resolvable:$true] %s956_s14 }
  0x77   : > { %v1303_v36 = vld [vmem:[#allocation7] sm:$0xff]   ;;  %v1306_v39 = vld [vmem:[#allocation7 + $0xc8] sm:$0xff]   ;;  %v1310_v43 = vld [vmem:[#allocation7 + $0xd0] sm:$0xff]   ;;  %v313_v4 = vsub.s32 0, %v312_v3  ;;  %v321_v5 = vsub.s32 2, %v312_v3  ;;  %v317_v7 = vsub.s32 1, %v312_v3  ;;  %s1738_s23 = scalar_lea.hbm %s1787_s5, %s1133_s15 }
  0x78   : > { %v1304_v37 = vld [vmem:[#allocation7 + $0x80] sm:$0xff]   ;;  %v1307_v40 = vld [vmem:[#allocation7 + $0x8] sm:$0xff]   ;;  %v1311_v44 = vld [vmem:[#allocation7 + $0x10] sm:$0xff]   ;;  %v325_v8 = vsub.s32 3, %v312_v3  ;;  %s943_s7 = scalar_lea.sflag [#allocation4], %s1710_s17  ;;  %s1419_s6 = scalar_lea.vmem %s1733_s14, 256 }
  0x79   : > { %504 = vmatpush1.bf16.msra.mxu0 %v1274_v15  ;;  %547 = vmatpush1.bf16.msra.mxu1 %v1275_v16  ;;  %v1308_v41 = vld [vmem:[#allocation7 + $0x88] sm:$0xff]   ;;  %v1312_v45 = vld [vmem:[#allocation7 + $0x90] sm:$0xff]   ;;  %v1313_v46 = vld [vmem:[#allocation7 + $0x58] sm:$0xff]   ;;  %p1420_p11 = scmp.ne.s32.totalorder %s1733_s14, %s1419_s6  ;;  %p1801_p0 = scmp.ne.s32.totalorder %s1796_s29, 0 }
  0x7a   : > { %505 = vmatprep.subr.bf16.mxu0 %v1276_v17  ;;  %548 = vmatprep.subr.bf16.mxu1 %v1278_v18  ;;  %v1314_v47 = vld [vmem:[#allocation7 + $0xd8] sm:$0xff]   ;;  %v1317_v50 = vld [vmem:[#allocation7 + $0x60] sm:$0xff]   ;;  %v1321_v54 = vld [vmem:[#allocation7 + $0x68] sm:$0xff]   ;;  %s1499_s22 = smov [#allocation8]  }
  0x7b   : > { %v1315_v48 = vld [vmem:[#allocation7 + $0x18] sm:$0xff]   ;;  %v1318_v51 = vld [vmem:[#allocation7 + $0xe0] sm:$0xff]   ;;  %v1322_v55 = vld [vmem:[#allocation7 + $0xe8] sm:$0xff]   ;;  %p1421_p1 = pnand %p1420_p11, %p1801_p0  ;;  %s1423_s8 = sshll.u32 %s1499_s22, 4  ;;  %s1424_s8 = int_to_ptr.vmem [resolvable:$false] %s1423_s8 }
  0x7c   : > { %v1316_v49 = vld [vmem:[#allocation7 + $0x98] sm:$0xff]   ;;  %v1319_v52 = vld [vmem:[#allocation7 + $0x20] sm:$0xff]   ;;  %v1323_v56 = vld [vmem:[#allocation7 + $0x28] sm:$0xff]   ;;  %s1425_s9 = scalar_lea.vmem %s1424_s8, 512  ;;  %p1426_p5 = scmp.lt.s32.totalorder %s1733_s14, %s1424_s8 }
  0x7d   : > { %506 = vmatpush1.bf16.msra.mxu0 %v1280_v19  ;;  %549 = vmatpush1.bf16.msra.mxu1 %v1281_v20  ;;  %v1320_v53 = vld [vmem:[#allocation7 + $0xa0] sm:$0xff]   ;;  %v1324_v57 = vld [vmem:[#allocation7 + $0xa8] sm:$0xff]   ;;  %v1325_v58 = vld [vmem:[#allocation7 + $0x70] sm:$0xff]   ;;  %p1422_p3 = pneg %p1421_p1  ;;  %p1427_p9 = scmp.lt.s32.totalorder %s1425_s9, %s1419_s6 }
  0x7e   : > { %507 = vmatprep.subr.bf16.mxu0 %v1282_v21  ;;  %550 = vmatprep.subr.bf16.mxu1 %v1284_v22  ;;  %v1326_v59 = vld [vmem:[#allocation7 + $0xf0] sm:$0xff]   ;;  %v1329_v62 = vld [vmem:[#allocation7 + $0x78] sm:$0xff]  }
  0x7f   : > { %v1327_v60 = vld [vmem:[#allocation7 + $0x30] sm:$0xff]   ;;  %v1330_v63 = vld [vmem:[#allocation7 + $0xf8] sm:$0xff]   ;;  %p1428_p12 = por %p1427_p9, %p1426_p5 }
  0x80   : > { %v1328_v61 = vld [vmem:[#allocation7 + $0xb0] sm:$0xff]   ;;  %v1331_v0 = vld [vmem:[#allocation7 + $0x38] sm:$0xff]  }
  0x81   : > { %508 = vmatpush1.bf16.msra.mxu0 %v1286_v23  ;;  %551 = vmatpush1.bf16.msra.mxu1 %v1287_v24  ;;  %v1332_v1 = vld [vmem:[#allocation7 + $0xb8] sm:$0xff]   ;;  %v309_v6 = vld [vmem:[%s1784_s2] sm:$0xf]  ;;  %p1429_p2 = pnand %p1428_p12, %p1422_p3 }
  0x82   : > { %509 = vmatprep.subr.bf16.mxu0 %v1288_v25  ;;  %552 = vmatprep.subr.bf16.mxu1 %v1290_v26  ;;  %v314_v9 = vrot.slane %v309_v6, %v313_v4  ;;  %v322_v10 = vrot.slane %v309_v6, %v321_v5  ;;  %v318_v11 = vrot.slane %v309_v6, %v317_v7 }
  0x83   : > { %v326_v12 = vrot.slane %v309_v6, %v325_v8 }
  0x85   : > { %510 = vmatpush1.bf16.msra.mxu0 %v1292_v27  ;;  %553 = vmatpush1.bf16.msra.mxu1 %v1293_v28 }
  0x86   : > { %511 = vmatprep.subr.bf16.mxu0 %v1294_v29  ;;  %554 = vmatprep.subr.bf16.mxu1 %v1296_v30 }
  0x89   : > { %512 = vmatpush1.bf16.msra.mxu0 %v1298_v31  ;;  %555 = vmatpush1.bf16.msra.mxu1 %v1299_v32 }
  0x8a   : > { %1134 = vmatprep.subr.bf16.mxu0 %v1301_v33  ;;  %1156 = vmatprep.subr.bf16.mxu1 %v1302_v35 }
  0x8c   : > { %530 = vmatmul.mubr.bf16.vlgmr.msra.gmra.mrb[0].mxu0 %v1300_v34  ;;  %573 = vmatmul.mubr.bf16.vlgmr.msra.gmra.mrb[0].mxu1 %v1300_v34 }
  0x8d   : > { %1135 = vmatpush3.bf16.msra.mxu0 %v1303_v36  ;;  %1157 = vmatpush3.bf16.msra.mxu1 %v1304_v37 }
  0x8e   : > { %1136 = vmatprep.subr.bf16.mxu0 %v1305_v38  ;;  %1158 = vmatprep.subr.bf16.mxu1 %v1306_v39 }
  0x91   : > { %1137 = vmatpush3.bf16.msra.mxu0 %v1307_v40  ;;  %1159 = vmatpush3.bf16.msra.mxu1 %v1308_v41 }
  0x92   : > { %1138 = vmatprep.subr.bf16.mxu0 %v1309_v42  ;;  %1160 = vmatprep.subr.bf16.mxu1 %v1310_v43  ;;  %v1094_v43 = vld [vmem:[%s1786_s4] ss:$0 sm:$0xff] }
  0x95   : > { %1139 = vmatpush3.bf16.msra.mxu0 %v1311_v44  ;;  %1161 = vmatpush3.bf16.msra.mxu1 %v1312_v45 }
  0x96   : > { %1140 = vmatprep.subr.bf16.mxu0 %v1313_v46  ;;  %1162 = vmatprep.subr.bf16.mxu1 %v1314_v47 }
  0x99   : > { %1141 = vmatpush3.bf16.msra.mxu0 %v1315_v48  ;;  %1163 = vmatpush3.bf16.msra.mxu1 %v1316_v49 }
  0x9a   : > { %1142 = vmatprep.subr.bf16.mxu0 %v1317_v50  ;;  %1164 = vmatprep.subr.bf16.mxu1 %v1318_v51 }
  0x9d   : > { %1143 = vmatpush3.bf16.msra.mxu0 %v1319_v52  ;;  %1165 = vmatpush3.bf16.msra.mxu1 %v1320_v53 }
  0x9e   : > { %1144 = vmatprep.subr.bf16.mxu0 %v1321_v54  ;;  %1166 = vmatprep.subr.bf16.mxu1 %v1322_v55 }
  0xa1   : > { %1145 = vmatpush3.bf16.msra.mxu0 %v1323_v56  ;;  %1167 = vmatpush3.bf16.msra.mxu1 %v1324_v57 }
  0xa2   : > { %1146 = vmatprep.subr.bf16.mxu0 %v1325_v58  ;;  %1168 = vmatprep.subr.bf16.mxu1 %v1326_v59 }
  0xa5   : > { %1147 = vmatpush3.bf16.msra.mxu0 %v1327_v60  ;;  %1169 = vmatpush3.bf16.msra.mxu1 %v1328_v61 }
  0xa6   : > { %1148 = vmatprep.subr.bf16.mxu0 %v1329_v62  ;;  %1170 = vmatprep.subr.bf16.mxu1 %v1330_v63 }
  0xa9   : > { %1149 = vmatpush3.bf16.msra.mxu0 %v1331_v0  ;;  %1171 = vmatpush3.bf16.msra.mxu1 %v1332_v1 }
 0x15f   : > { %v531_v13 = vpop.f32.mrb[0].mxu0  ;;  %v574_v14 = vpop.f32.mrb[0].mxu1 }
 0x160   : > { %v532_v15 = vadd.f32 %v531_v13, %v314_v9  ;;  %v575_v16 = vadd.f32 %v574_v14, %v322_v10  ;;  %v533_v17 = vpop.f32.mrb[1].mxu0  ;;  %v576_v18 = vpop.f32.mrb[1].mxu1 }
 0x161   : > { %v534_v19 = vadd.f32 %v533_v17, %v318_v11  ;;  %v577_v20 = vadd.f32 %v576_v18, %v326_v12  ;;  %v535_v21 = vpop.f32.mrb[2].mxu0  ;;  %v578_v22 = vpop.f32.mrb[2].mxu1 }
 0x162   : > { %v585_v23 = vmax.f32 %v575_v16, 0.0  ;;  %v536_v24 = vadd.f32 %v535_v21, %v314_v9  ;;  %v579_v25 = vadd.f32 %v578_v22, %v322_v10  ;;  %v537_v26 = vpop.f32.mrb[3].mxu0  ;;  %v580_v27 = vpop.f32.mrb[3].mxu1  ;;  %v583_v31 = vmax.f32 %v532_v15, 0.0 }
 0x163   : > { %v586_v28 = vmax.f32 %v577_v20, 0.0  ;;  %v538_v29 = vadd.f32 %v537_v26, %v318_v11  ;;  %v581_v30 = vadd.f32 %v580_v27, %v326_v12  ;;  %v584_v34 = vmax.f32 %v534_v19, 0.0 }
 0x164   : > { %v587_v32 = vmax.f32 %v536_v24, 0.0  ;;  %v589_v33 = vmax.f32 %v579_v25, 0.0 }
 0x165   : > { %v588_v35 = vmax.f32 %v538_v29, 0.0  ;;  %v590_v36 = vmax.f32 %v581_v30, 0.0 }
 0x166   : > { %v591_v37 = vpack.c.bf16 %v587_v32, %v583_v31  ;;  %v593_v38 = vpack.c.bf16 %v589_v33, %v585_v23 }
 0x167   : > { %v592_v39 = vpack.c.bf16 %v588_v35, %v584_v34  ;;  %v594_v40 = vpack.c.bf16 %v590_v36, %v586_v28 }
 0x169   : > { %890 = vmatprep.mubr.bf16.mxu0 %v592_v39  ;;  %931 = vmatprep.mubr.bf16.mxu1 %v594_v40 }
 0x16a   : > { %891 = vmatmul.mubr.bf16.vlgmr.msra.gmra.mrb[4].mxu0 %v591_v37  ;;  %932 = vmatmul.mubr.bf16.vlgmr.msra.gmra.mrb[4].mxu1 %v593_v38 }
 0x23d   : > { %v1150_v41 = vpop.f32.mrb[4].mxu0  ;;  %v1172_v42 = vpop.f32.mrb[4].mxu1 }
 0x23e   : > { %v1151_v44 = vpop.f32.mrb[5].mxu0  ;;  %v1173_v45 = vpop.f32.mrb[5].mxu1 }
 0x23f   : > { %v1152_v46 = vadd.f32 %v1151_v44, %v1150_v41  ;;  %v1174_v47 = vadd.f32 %v1173_v45, %v1172_v42  ;;  %v1153_v48 = vpop.f32.mrb[6].mxu0  ;;  %v1175_v49 = vpop.f32.mrb[6].mxu1 }
 0x240   : > { %v1154_v50 = vpop.f32.mrb[7].mxu0  ;;  %v1176_v51 = vpop.f32.mrb[7].mxu1 }
 0x241   : > { %v893_v52 = vadd.f32 %v1152_v46, %v1094_v43  ;;  %v1155_v53 = vadd.f32 %v1154_v50, %v1153_v48  ;;  %v1177_v54 = vadd.f32 %v1176_v51, %v1175_v49 }
 0x243   : > { %v934_v55 = vadd.f32 %v1174_v47, %v893_v52  ;;  %v896_v56 = vadd.f32 %v1155_v53, %v1094_v43 }
 0x245   : > { %940 = vst [vmem:[%s271_s28] sm:$0xff] %v934_v55  ;;  %v937_v57 = vadd.f32 %v1177_v54, %v896_v56 }
 0x247   : > { %941 = vst [vmem:[%s271_s28 + $0x8] sm:$0xff] %v937_v57 }
 0x248   : > { %1432 = shalt.err (!%p1429_p2)
}
 0x249   : > { %s1433_s24 = scalar_lea.hbm %s1738_s23, 256  ;;  %s1437_s13 = scalar_lea.hbm %s1787_s5, 512 }
 0x24a   : > { %p1434_p13 = scmp.ne.s32.totalorder %s1738_s23, %s1433_s24  ;;  %p1438_p4 = scmp.lt.u32.totalorder %s1738_s23, %s1787_s5 }
 0x24b   : > { %p1439_p7 = scmp.lt.u32.totalorder %s1437_s13, %s1433_s24  ;;  %p1441_p11 = scmp.lt.u32.totalorder %s1433_s24, %s1738_s23 }
 0x24c   : > { %p1435_p6 = pnand %p1434_p13, %p1801_p0 }
 0x24d   : > { %p1440_p8 = por %p1439_p7, %p1438_p4 }
 0x24e   : > { %p1436_p10 = pneg %p1435_p6 }
 0x24f   : > { %p1442_p1 = por %p1441_p11, %p1440_p8 }
 0x251   : > { %p1443_p3 = pnand %p1442_p1, %p1436_p10 }
 0x253   : > { %1446 = shalt.err (!%p1443_p3)
}
 0x254   : > { %s1500_s15 = smov 128   ;;  %s1501_s30 = smov 8  }
 0x255   : > { %1188 = dma.vmem_to_hbm [thread:$0]  (%p1801_p0), %s1733_s14, 256, %s1738_s23, %s943_s7, %s1500_s15, %s1500_s15, %s1501_s30  }
 0x256 PF: > { %s971_s11 = sand.u32 1, %s1477_s18   ;;  %p1802_p5 = scmp.ne.s32.totalorder %s1792_s25, 0 }
 0x257   : > { %p1803_p9 = scmp.ge.s32.totalorder %s1489_s21, 2  ;;  %s972_s6 = scalar_lea.sflag [#allocation4], %s971_s11 }
 0x259   : > { %p1202_p12 = pnand %p1803_p9, %p1802_p5 }
 0x25b   : > { %1472 = dma.done.wait (!%p1202_p12), %s972_s6, 256  }
 0x25c   : > { %1474 = vsyncadd (!%p1202_p12), %s972_s6, 4294967040  ;;  %p19_p2 = scmp.ge.s32.totalorder %s1645_s16, 4   ;;  %s1804_s18 = smov %s1481_s19 }
 0x25d   : > { %s1805_s19 = smov %s1485_s20  ;;  %s1806_s20 = smov %s1654_s27 }
 0x25e   : > { %s1807_s21 = smov %s1645_s16  ;;  %21 = sbr.rel (!%p19_p2) target bundleno = 6 (0x6), region = 93 }
 0x265   :  { %977 = vsyncpa [#allocation3], 1 }
 0x266   :  { %979 = vsyncpa [#allocation3 + $0x1], 1 }
 0x267   :  { %980 = vsyncpa [#allocation6], 1 }
 0x268   :  { %981 = vsyncpa [#allocation4], 1 }
 0x269   :  { %983 = vsyncpa [#allocation4 + $0x1], 1 }

</bundles_post_ra>
